<compile_context>
chip_gen: v7x
topology: tpu7x:2x2x1
jax: 0.10.0
libtpu: 0.0.40
codegen_flags: <defaults>
</compile_context>

<pallas_src>
import jax
import jax.numpy as jnp
from jax.experimental import pallas as pl
from jax.experimental.pallas import tpu as pltpu

EMBED_DIM = 10
NUM_HEADS = 2
HIDDEN = NUM_HEADS * EMBED_DIM      # 20
LANE_PAD = 128                      # lane-dense fused-output width (3*HIDDEN=60 -> pad to 128)

# Column offsets of each projection inside the fused weight / output.
Q_COL = 0
K_COL = HIDDEN          # 20
V_COL = 2 * HIDDEN      # 40


def _round_up(x, m):
    return ((x + m - 1) // m) * m


def _fused_qkv_kernel(x_ref, w_ref, b_ref, o_ref):
    # x: (M_pad, E) f32, w: (E, LANE_PAD) f32 with q/k/v weights column-packed,
    # b: (1, LANE_PAD) f32.  One MXU dot + one VPU broadcast-add, one full-tile store.
    o_ref[...] = jnp.dot(x_ref[...], w_ref[...],
                         preferred_element_type=jnp.float32) + b_ref[...]


def fused_qkv_projection(x_stacked, prepped):
    """x_stacked: (M_pad, E) f32 (rows: [q | k | v | zero-pad]).
    Returns (M_pad, LANE_PAD) f32 = x_stacked @ W_fused + b_fused."""
    M_pad, E = x_stacked.shape

    cost = pl.CostEstimate(
        flops=2 * M_pad * E * LANE_PAD,
        transcendentals=0,
        bytes_accessed=4 * (M_pad * E + E * LANE_PAD + LANE_PAD + M_pad * LANE_PAD),
    )

    vmem_spec = pl.BlockSpec(memory_space=pltpu.MemorySpace.VMEM)
    return pl.pallas_call(
        _fused_qkv_kernel,
        out_shape=jax.ShapeDtypeStruct((M_pad, LANE_PAD), jnp.float32),
        in_specs=[vmem_spec, vmem_spec, vmem_spec],
        out_specs=vmem_spec,
        cost_estimate=cost,
    )(x_stacked, prepped["w_fused"], prepped["b_fused"])


def init_params(key):
    """Deterministic synthetic parameters matching the PyTorch module shapes
    (weights stored PyTorch-style as (out_features, in_features))."""
    keys = jax.random.split(key, 8)

    def lin(kw, kb, out_f, in_f):
        bound = 1.0 / jnp.sqrt(in_f)
        w = jax.random.uniform(kw, (out_f, in_f), jnp.float32, -bound, bound)
        b = jax.random.uniform(kb, (out_f,), jnp.float32, -bound, bound)
        return w, b

    wq, bq = lin(keys[0], keys[1], HIDDEN, EMBED_DIM)
    wk, bk = lin(keys[2], keys[3], HIDDEN, EMBED_DIM)
    wv, bv = lin(keys[4], keys[5], HIDDEN, EMBED_DIM)
    # TODO(synk): out_projection (wo, bo) is never used in the reference forward.
    wo, bo = lin(keys[6], keys[7], EMBED_DIM, HIDDEN)
    return dict(wq=wq, bq=bq, wk=wk, bk=bk, wv=wv, bv=bv, wo=wo, bo=bo)


def prepare_params(params):
    """One-time prep (outside the per-forward hot path): transpose q/k/v weights to
    (in, out) and pack them into disjoint 20-wide column ranges of a single
    (E, 128) weight; pack the three biases into a single (1, 128) row."""
    w_fused = jnp.zeros((EMBED_DIM, LANE_PAD), jnp.float32)
    b_fused = jnp.zeros((1, LANE_PAD), jnp.float32)
    for name_w, name_b, col in (("wq", "bq", Q_COL), ("wk", "bk", K_COL), ("wv", "bv", V_COL)):
        wt = jnp.asarray(params[name_w], jnp.float32).T        # (E, HIDDEN)
        w_fused = w_fused.at[:, col:col + HIDDEN].set(wt)
        b_fused = b_fused.at[0, col:col + HIDDEN].set(jnp.asarray(params[name_b], jnp.float32))
    return dict(w_fused=w_fused, b_fused=b_fused)


def model_forward(prepped, query_tensor, key_tensor, value_tensor, attn_mask):
    # attn_mask is accepted but never used, exactly as in the reference forward.
    B, Sq, E = query_tensor.shape
    _, Sk, _ = key_tensor.shape
    _, Sv, _ = value_tensor.shape
    Mq, Mk, Mv = B * Sq, B * Sk, B * Sv
    M = Mq + Mk + Mv
    M_pad = _round_up(M, 8)          # full (8k, 128) output tile -> unmasked stores

    # Row-stack q/k/v and zero-pad to M_pad rows (cheap XLA concat/pad, fuses away).
    x_stacked = jnp.concatenate(
        [query_tensor.reshape(Mq, E),
         key_tensor.reshape(Mk, E),
         value_tensor.reshape(Mv, E)], axis=0)
    if M_pad > M:
        x_stacked = jnp.concatenate(
            [x_stacked, jnp.zeros((M_pad - M, E), jnp.float32)], axis=0)

    out = fused_qkv_projection(x_stacked, prepped)   # (M_pad, 128)

    # Slice each projection's (row range, column range) and fold the
    # (B, S, num_heads, embed_dim) view in.
    query_proj = out[0:Mq, Q_COL:Q_COL + HIDDEN].reshape(B, Sq, NUM_HEADS, EMBED_DIM)
    key_proj = out[Mq:Mq + Mk, K_COL:K_COL + HIDDEN].reshape(B, Sk, NUM_HEADS, EMBED_DIM)
    value_proj = out[Mq + Mk:Mq + Mk + Mv, V_COL:V_COL + HIDDEN].reshape(
        B, Sv, NUM_HEADS, EMBED_DIM)

    # TODO(synk): the reference forward views key_proj/value_proj with query_proj's
    # size (a shape-mismatch error when S_q != S_kv) and has no return statement
    # (returns None); here each tensor is viewed with its own size and the three
    # projected tensors are returned so the kernel result is observable.
    return query_proj, key_proj, value_proj


if __name__ == "__main__":
    root = jax.random.PRNGKey(0)
    pkey, k1, k2, k3 = jax.random.split(root, 4)
    params = init_params(pkey)
    prepped = prepare_params(params)   # weight packing hoisted out of forward

    # Shapes consistent with the module's example tensors.
    query = jax.random.normal(k1, (1, 2, EMBED_DIM), jnp.float32)
    key = jax.random.normal(k2, (1, 4, EMBED_DIM), jnp.float32)
    value = jax.random.normal(k3, (1, 4, EMBED_DIM), jnp.float32)
    attn_mask = jnp.zeros((1, 2, 4), jnp.float32)  # unused, as in the reference

    fwd = jax.jit(model_forward)
    q_out, k_out, v_out = fwd(prepped, query, key, value, attn_mask)
    jax.block_until_ready((q_out, k_out, v_out))

    # Cross-check against a plain-JAX reference of the same math.
    ref_q = (query.reshape(2, EMBED_DIM) @ params["wq"].T + params["bq"]).reshape(
        1, 2, NUM_HEADS, EMBED_DIM)
    ref_k = (key.reshape(4, EMBED_DIM) @ params["wk"].T + params["bk"]).reshape(
        1, 4, NUM_HEADS, EMBED_DIM)
    ref_v = (value.reshape(4, EMBED_DIM) @ params["wv"].T + params["bv"]).reshape(
        1, 4, NUM_HEADS, EMBED_DIM)
    assert jnp.allclose(q_out, ref_q, atol=1e-5), "query projection mismatch"
    assert jnp.allclose(k_out, ref_k, atol=1e-5), "key projection mismatch"
    assert jnp.allclose(v_out, ref_v, atol=1e-5), "value projection mismatch"
    assert q_out.shape == (1, 2, NUM_HEADS, EMBED_DIM)
    assert k_out.shape == (1, 4, NUM_HEADS, EMBED_DIM)
    assert v_out.shape == (1, 4, NUM_HEADS, EMBED_DIM)
    print("KERNEL_OK")
</pallas_src>

<mosaic_0001>
module attributes {stable_mosaic.version = 11 : i64} {
  func.func @_fused_qkv_kernel(%arg0: memref<16x10xf32, #tpu.memory_space<vmem>>, %arg1: memref<10x128xf32, #tpu.memory_space<vmem>>, %arg2: memref<1x128xf32, #tpu.memory_space<vmem>>, %arg3: memref<16x128xf32, #tpu.memory_space<vmem>>) attributes {dimension_semantics = [], scalar_prefetch = 0 : i64, scratch_operands = 0 : i64, tpu.core_type = #tpu.core_type<tc>} {
    %c0 = arith.constant 0 : index
    %c0_0 = arith.constant 0 : index
    %0 = vector.load %arg0[%c0, %c0_0] : memref<16x10xf32, #tpu.memory_space<vmem>>, vector<16x10xf32>
    %c0_1 = arith.constant 0 : index
    %c0_2 = arith.constant 0 : index
    %1 = vector.load %arg1[%c0_1, %c0_2] : memref<10x128xf32, #tpu.memory_space<vmem>>, vector<10x128xf32>
    %cst = arith.constant dense<0.000000e+00> : vector<16x128xf32>
    %2 = tpu.matmul %0, %1, %cst {dimension_numbers = #tpu.dot_dimension_numbers<[1], [0], [0], [1], [0, 0, 1, 1], [], []>} : vector<16x10xf32>, vector<10x128xf32>, vector<16x128xf32> -> vector<16x128xf32>
    %c0_3 = arith.constant 0 : index
    %c0_4 = arith.constant 0 : index
    %3 = vector.load %arg2[%c0_3, %c0_4] : memref<1x128xf32, #tpu.memory_space<vmem>>, vector<1x128xf32>
    %4 = vector.broadcast %3 : vector<1x128xf32> to vector<16x128xf32>
    %5 = arith.addf %2, %4 : vector<16x128xf32>
    %c0_5 = arith.constant 0 : index
    %c0_6 = arith.constant 0 : index
    %6 = vector.load %arg3[%c0_5, %c0_6] : memref<16x128xf32, #tpu.memory_space<vmem>>, vector<16x128xf32>
    tpu.vector_store %arg3[%c0_5, %c0_6], %5 {strides = array<i32>} : memref<16x128xf32, #tpu.memory_space<vmem>>, vector<16x128xf32>,
    return
  }
}

</mosaic_0001>

<bundles_post_ra>
// kernel: model_forward.1
= control target key start
LH: loop header
LB: loop body
LE: loop exit
PB: predicated region body
PF: predicated region fallthrough
CT: control target
= control target key end

     0   :  { %vm32_vm0 = vcmask 1041408   ;;  %vm25_vm1 = vcmask 80896   ;;  %vm139_vm2 = vmmov 1   ;;  %s181_s1 = inlined_call_operand.vmem [shape: f32[10,128], index: 1, kind: input, shape index: {}]   ;;  %s182_s0 = inlined_call_operand.vmem [shape: f32[16,10], index: 0, kind: input, shape index: {}]   ;;  %s183_s2 = inlined_call_operand.vmem [shape: f32[1,128], index: 2, kind: input, shape index: {}]   ;;  %s184_s3 = inlined_call_operand.vmem [shape: f32[16,128], index: 3, kind: output, shape index: {}]  }
   0x1   :  { %v16_v0 = vld [vmem:[%s181_s1] sm:$0xff]  ;;  %v17_v1 = vld [vmem:[%s181_s1 + $0x8] sm:$0x3]  ;;  %vm133_vm3 = vmpackc.low %vm32_vm0, %vm139_vm2 }
   0x2   :  { %v132_v2 = vpack.c.bf16 %v17_v1, %v16_v0  ;;  %v14_v3 = vld [vmem:[%s182_s0] sm:$0xff]  ;;  %v15_v4 = vld [vmem:[%s182_s0 + $0x8] sm:$0xff] }
   0x3   :  { %129 = vmatprep.mubr.msk.f32.mxu0 %vm25_vm1, %v14_v3  ;;  %v117_v5 = vld [vmem:[%s183_s2] ss:$0 sm:$0xff] }
   0x4   :  { %134 = vmatprep.subr.msk.bf16.mxu0 %vm133_vm3, %v132_v2 }
   0x5   :  { %137 = vmatpush3.bf16.msk.msra.mxu0 %vm133_vm3, %v132_v2 }
   0x8   :  { %130 = vmatmul.mubr.msk.f32.vlgmr.msra.gmra.mrb[0].mxu0 %vm25_vm1, %v15_v4 }
  0xdb   :  { %v131_v6 = vpop.f32.mrb[0].mxu0 }
  0xdc   :  { %v108_v7 = vadd.f32 %v131_v6, %v117_v5  ;;  %v102_v8 = vpop.f32.mrb[1].mxu0 }
  0xdd   :  { %v103_v9 = vadd.f32 %v117_v5, %v102_v8 }
  0xde   :  { %112 = vst [vmem:[%s184_s3 + $0x8] sm:$0xff] %v108_v7 }
  0xdf   :  { %111 = vst [vmem:[%s184_s3] sm:$0xff] %v103_v9 }

</bundles_post_ra>
